<compile_context>
chip_gen: v7x
topology: tpu7x:2x2x1
jax: 0.10.0
libtpu: 0.0.40
codegen_flags: <defaults>
</compile_context>

<pallas_src>
import functools
import math

import jax
import jax.numpy as jnp
from jax import lax
from jax.experimental import pallas as pl
from jax.experimental.pallas import tpu as pltpu

_VMEM_LIMIT = 32 * 1024 * 1024   # conservative scoped-VMEM cap; fits v5e/v6e/v7x
_LOG2E = math.log2(math.e)


def _pick_tile(n: int, target: int, step: int = 8) -> int:
    """Largest tile <= target that evenly divides n (multiples of `step`)."""
    if n <= target:
        return n
    for t in range(target - target % step, step - 1, -step):
        if n % t == 0:
            return t
    return n  # fall back to the whole axis


def _fused_attn_kernel(x_ref, w_ref, b_ref, o_ref, q_sc, k_sc, v_sc,
                       *, d, tq, tk, nk):
    # x_ref: (S, E)   w_ref: (E, 3D+1)   b_ref: (1, 3D+1)   o_ref: (TQ, D)
    # q_sc: (S, D)  k_sc: (S, D)  v_sc: (S, D+1)  (V with a trailing ones col)
    qi = pl.program_id(1)

    # ---- fused QKV projection, once per batch element (qi == 0) ----------
    @pl.when(qi == 0)
    def _project():
        qkv = jnp.dot(x_ref[...], w_ref[...],
                      preferred_element_type=jnp.float32) + b_ref[...]
        q_sc[...] = qkv[:, :d].astype(q_sc.dtype)        # pre-scaled Q
        k_sc[...] = qkv[:, d:2 * d].astype(k_sc.dtype)   # K
        v_sc[...] = qkv[:, 2 * d:].astype(v_sc.dtype)    # V | ones

    # ---- flash attention for this query tile ------------------------------
    q_start = pl.multiple_of(qi * tq, tq)
    q = q_sc[pl.ds(q_start, tq), :]                       # (TQ, D)

    def body(ki, carry):
        m_prev, acc_prev = carry                          # (TQ,1), (TQ,D+1)
        k_start = pl.multiple_of(ki * tk, tk)
        k_t = k_sc[pl.ds(k_start, tk), :]                 # (TK, D)
        v_t = v_sc[pl.ds(k_start, tk), :]                 # (TK, D+1)
        # Scores (already scaled and in base-2 log domain); no k.T materialized.
        s = lax.dot_general(q, k_t, (((1,), (1,)), ((), ())),
                            preferred_element_type=jnp.float32)  # (TQ, TK)
        m_new = jnp.maximum(m_prev, jnp.max(s, axis=-1, keepdims=True))
        alpha = jnp.exp2(m_prev - m_new)                  # (TQ, 1)
        p = jnp.exp2(s - m_new)                           # (TQ, TK)
        # Ones column of v_t makes this matmul also produce the row-sum of p,
        # so the softmax denominator rides along in lane D of the accumulator.
        pv = jnp.dot(p.astype(v_t.dtype), v_t,
                     preferred_element_type=jnp.float32)  # (TQ, D+1)
        return m_new, alpha * acc_prev + pv

    m0 = jnp.full((tq, 1), -jnp.inf, dtype=jnp.float32)
    acc0 = jnp.zeros((tq, d + 1), dtype=jnp.float32)
    _, acc = lax.fori_loop(0, nk, body, (m0, acc0), unroll=nk <= 8)

    # Dropout on attention weights: identity in eval mode.

    # Normalize the (TQ, D) accumulator; approx reciprocal runs on the EUP.
    inv_l = pl.reciprocal(acc[:, d:], approx=True)        # (TQ, 1)
    o_ref[...] = (acc[:, :d] * inv_l).astype(o_ref.dtype)


def scaled_dot_product_attention(x, wq, bq, wk, bk, wv, bv, *, qkv_dim,
                                 compute_dtype=jnp.float32):
    """x: (B, S, E).  Weights (E, D), biases (D,).  Returns (B, S, D)."""
    B, S, E = x.shape
    D = qkv_dim
    out_dtype = x.dtype
    f32 = jnp.float32

    # Host-side prep: fuse wq|wk|wv plus a zero column (-> ones after bias)
    # into one (E, 3D+1) weight.  Fold the softmax scale * log2(e) into the Q
    # part so the kernel uses base-2 exponentials with no extra multiply.
    scale = (float(D) ** -0.5) * _LOG2E
    w_qkv = jnp.concatenate(
        [wq.astype(f32) * scale, wk.astype(f32), wv.astype(f32),
         jnp.zeros((E, 1), f32)], axis=1).astype(compute_dtype)      # (E, 3D+1)
    b_qkv = jnp.concatenate(
        [bq.astype(f32) * scale, bk.astype(f32), bv.astype(f32),
         jnp.ones((1,), f32)]).reshape(1, 3 * D + 1)                 # f32

    step = 16 if compute_dtype == jnp.bfloat16 else 8
    TQ = _pick_tile(S, 128, step)   # modest TQ keeps the (TQ,TK) chain in vregs
    TK = _pick_tile(S, 256, step)
    nq, nk = S // TQ, S // TK

    x_c = x.astype(compute_dtype)

    kernel = functools.partial(_fused_attn_kernel, d=D, tq=TQ, tk=TK, nk=nk)

    return pl.pallas_call(
        kernel,
        out_shape=jax.ShapeDtypeStruct((B, S, D), out_dtype),
        grid_spec=pltpu.PrefetchScalarGridSpec(
            num_scalar_prefetch=0,
            grid=(B, nq),
            in_specs=[
                # Whole sequence per batch element; constant across qi, so the
                # (S, E) block is DMA'd once per b (no kv re-fetch).
                pl.BlockSpec((None, S, E), lambda b, qi: (b, 0, 0)),
                # Loop-invariant fused weight / bias.
                pl.BlockSpec((E, 3 * D + 1), lambda b, qi: (0, 0)),
                pl.BlockSpec((1, 3 * D + 1), lambda b, qi: (0, 0)),
            ],
            out_specs=pl.BlockSpec((None, TQ, D), lambda b, qi: (b, qi, 0)),
            scratch_shapes=[
                pltpu.VMEM((S, D), compute_dtype),       # Q (pre-scaled)
                pltpu.VMEM((S, D), compute_dtype),       # K
                pltpu.VMEM((S, D + 1), compute_dtype),   # V | ones
            ],
        ),
        compiler_params=pltpu.CompilerParams(
            dimension_semantics=("parallel", "arbitrary"),
            vmem_limit_bytes=_VMEM_LIMIT),
    )(x_c, w_qkv, b_qkv)


def _reference(x, wq, bq, wk, bk, wv, bv, qkv_dim):
    scale = float(qkv_dim) ** -0.5
    q = x @ wq + bq
    k = x @ wk + bk
    v = x @ wv + bv
    s = jnp.einsum("bqd,bkd->bqk", q, k) * scale
    p = jax.nn.softmax(s, axis=-1)
    return jnp.einsum("bqk,bkd->bqd", p, v)


if __name__ == "__main__":
    # Small shapes consistent with the module's forward: (batch, seq, embed)
    B, S, E, D = 2, 8, 32, 16

    key = jax.random.PRNGKey(0)
    kx, kwq, kbq, kwk, kbk, kwv, kbv = jax.random.split(key, 7)

    # Deterministic parameter init (PyTorch-Linear-like uniform bound 1/sqrt(E))
    bound = 1.0 / (E ** 0.5)
    x = jax.random.normal(kx, (B, S, E), dtype=jnp.float32)
    wq = jax.random.uniform(kwq, (E, D), jnp.float32, -bound, bound)
    bq = jax.random.uniform(kbq, (D,), jnp.float32, -bound, bound)
    wk = jax.random.uniform(kwk, (E, D), jnp.float32, -bound, bound)
    bk = jax.random.uniform(kbk, (D,), jnp.float32, -bound, bound)
    wv = jax.random.uniform(kwv, (E, D), jnp.float32, -bound, bound)
    bv = jax.random.uniform(kbv, (D,), jnp.float32, -bound, bound)

    ref = _reference(x, wq, bq, wk, bk, wv, bv, D)

    # f32-operand path (matches module semantics; approx reciprocal only).
    out = scaled_dot_product_attention(x, wq, bq, wk, bk, wv, bv, qkv_dim=D)
    out = jax.block_until_ready(out)
    assert out.shape == (B, S, D)
    assert jnp.allclose(out, ref, atol=5e-3, rtol=5e-3), "f32 path mismatch"

    # bf16-operand path (MXU/EUP-friendly on v6e/v7x); f32 accumulation,
    # pre-softmax quantization -> looser tolerance.
    out_bf16 = scaled_dot_product_attention(
        x, wq, bq, wk, bk, wv, bv, qkv_dim=D, compute_dtype=jnp.bfloat16)
    out_bf16 = jax.block_until_ready(out_bf16)
    assert out_bf16.shape == (B, S, D)
    assert jnp.allclose(out_bf16, ref, atol=5e-2, rtol=5e-2), "bf16 path mismatch"

    print("KERNEL_OK")
</pallas_src>

<mosaic_0001>
module attributes {stable_mosaic.version = 11 : i64} {
  func.func @_fused_attn_kernel(%arg0: i32, %arg1: i32, %arg2: memref<1x8x32xf32, #tpu.memory_space<vmem>>, %arg3: memref<32x49xf32, #tpu.memory_space<vmem>>, %arg4: memref<1x49xf32, #tpu.memory_space<vmem>>, %arg5: memref<1x8x16xf32, #tpu.memory_space<vmem>>, %arg6: memref<8x16xf32, #tpu.memory_space<vmem>>, %arg7: memref<8x16xf32, #tpu.memory_space<vmem>>, %arg8: memref<8x17xf32, #tpu.memory_space<vmem>>) attributes {dimension_semantics = [#tpu.dimension_semantics<parallel>, #tpu.dimension_semantics<arbitrary>], iteration_bounds = array<i64: 2, 1>, scalar_prefetch = 0 : i64, scratch_operands = 3 : i64, tpu.core_type = #tpu.core_type<tc>, window_params = [{transform_indices = @transform_0, window_bounds = array<i64: 1, 8, 32>}, {pipeline_mode = #tpu.pipeline_mode<synchronous>, transform_indices = @transform_1, window_bounds = array<i64: 32, 49>}, {pipeline_mode = #tpu.pipeline_mode<synchronous>, transform_indices = @transform_2, window_bounds = array<i64: 1, 49>}, {transform_indices = @transform_3, window_bounds = array<i64: 1, 8, 16>}]} {
    %c0_i32 = arith.constant 0 : i32
    %0 = arith.cmpi eq, %arg1, %c0_i32 : i32
    %1 = arith.extui %0 : i1 to i32
    %c0_i32_0 = arith.constant 0 : i32
    %2 = arith.cmpi ne, %1, %c0_i32_0 : i32
    scf.if %2 {
      %c0_12 = arith.constant 0 : index
      %c0_13 = arith.constant 0 : index
      %c0_14 = arith.constant 0 : index
      %36 = vector.load %arg2[%c0_12, %c0_13, %c0_14] : memref<1x8x32xf32, #tpu.memory_space<vmem>>, vector<1x8x32xf32>
      %37 = vector.shape_cast %36 : vector<1x8x32xf32> to vector<8x32xf32>
      %c0_15 = arith.constant 0 : index
      %c0_16 = arith.constant 0 : index
      %38 = vector.load %arg3[%c0_15, %c0_16] : memref<32x49xf32, #tpu.memory_space<vmem>>, vector<32x49xf32>
      %cst_17 = arith.constant dense<0.000000e+00> : vector<8x49xf32>
      %39 = tpu.matmul %37, %38, %cst_17 {dimension_numbers = #tpu.dot_dimension_numbers<[1], [0], [0], [1], [0, 0, 1, 1], [], []>} : vector<8x32xf32>, vector<32x49xf32>, vector<8x49xf32> -> vector<8x49xf32>
      %c0_18 = arith.constant 0 : index
      %c0_19 = arith.constant 0 : index
      %40 = vector.load %arg4[%c0_18, %c0_19] : memref<1x49xf32, #tpu.memory_space<vmem>>, vector<1x49xf32>
      %41 = vector.broadcast %40 : vector<1x49xf32> to vector<8x49xf32>
      %42 = arith.addf %39, %41 : vector<8x49xf32>
      %43 = vector.extract_strided_slice %42 {offsets = [0, 0], sizes = [8, 16], strides = [1, 1]} : vector<8x49xf32> to vector<8x16xf32>
      %c0_20 = arith.constant 0 : index
      %c0_21 = arith.constant 0 : index
      %44 = vector.load %arg6[%c0_20, %c0_21] : memref<8x16xf32, #tpu.memory_space<vmem>>, vector<8x16xf32>
      tpu.vector_store %arg6[%c0_20, %c0_21], %43 {strides = array<i32>} : memref<8x16xf32, #tpu.memory_space<vmem>>, vector<8x16xf32>,
      %45 = vector.extract_strided_slice %42 {offsets = [0, 16], sizes = [8, 16], strides = [1, 1]} : vector<8x49xf32> to vector<8x16xf32>
      %c0_22 = arith.constant 0 : index
      %c0_23 = arith.constant 0 : index
      %46 = vector.load %arg7[%c0_22, %c0_23] : memref<8x16xf32, #tpu.memory_space<vmem>>, vector<8x16xf32>
      tpu.vector_store %arg7[%c0_22, %c0_23], %45 {strides = array<i32>} : memref<8x16xf32, #tpu.memory_space<vmem>>, vector<8x16xf32>,
      %47 = vector.extract_strided_slice %42 {offsets = [0, 32], sizes = [8, 17], strides = [1, 1]} : vector<8x49xf32> to vector<8x17xf32>
      %c0_24 = arith.constant 0 : index
      %c0_25 = arith.constant 0 : index
      %48 = vector.load %arg8[%c0_24, %c0_25] : memref<8x17xf32, #tpu.memory_space<vmem>>, vector<8x17xf32>
      tpu.vector_store %arg8[%c0_24, %c0_25], %47 {strides = array<i32>} : memref<8x17xf32, #tpu.memory_space<vmem>>, vector<8x17xf32>,
    } else {
    }
    %c8_i32 = arith.constant 8 : i32
    %3 = arith.muli %arg1, %c8_i32 : i32
    %4 = tpu.assume_multiple %3, 8 : i32
    %5 = arith.index_cast %4 : i32 to index
    %c0 = arith.constant 0 : index
    %6 = vector.load %arg6[%5, %c0] : memref<8x16xf32, #tpu.memory_space<vmem>>, vector<8x16xf32>
    %cst = arith.constant 0xFF800000 : f32
    %7 = vector.broadcast %cst : f32 to vector<8x1xf32>
    %cst_1 = arith.constant 0.000000e+00 : f32
    %8 = vector.broadcast %cst_1 : f32 to vector<8x17xf32>
    %c0_i32_2 = arith.constant 0 : i32
    %c8_i32_3 = arith.constant 8 : i32
    %9 = arith.muli %c0_i32_2, %c8_i32_3 : i32
    %10 = tpu.assume_multiple %9, 8 : i32
    %11 = arith.index_cast %10 : i32 to index
    %c0_4 = arith.constant 0 : index
    %12 = vector.load %arg7[%11, %c0_4] : memref<8x16xf32, #tpu.memory_space<vmem>>, vector<8x16xf32>
    %13 = arith.index_cast %10 : i32 to index
    %c0_5 = arith.constant 0 : index
    %14 = vector.load %arg8[%13, %c0_5] : memref<8x17xf32, #tpu.memory_space<vmem>>, vector<8x17xf32>
    %cst_6 = arith.constant dense<0.000000e+00> : vector<8x8xf32>
    %15 = tpu.matmul %6, %12, %cst_6 {dimension_numbers = #tpu.dot_dimension_numbers<[1], [1], [0], [0], [0, 0, 1, 0], [], []>} : vector<8x16xf32>, vector<8x16xf32>, vector<8x8xf32> -> vector<8x8xf32>
    %cst_7 = arith.constant dense<0xFF800000> : vector<8xf32>
    %16 = vector.multi_reduction <maximumf>, %15, %cst_7 [1] : vector<8x8xf32> to vector<8xf32>
    %17 = vector.shape_cast %16 : vector<8xf32> to vector<8x1xf32>
    %18 = arith.maximumf %7, %17 : vector<8x1xf32>
    %19 = arith.subf %7, %18 : vector<8x1xf32>
    %20 = math.exp2 %19 : vector<8x1xf32>
    %21 = vector.broadcast %18 : vector<8x1xf32> to vector<8x8xf32>
    %22 = arith.subf %15, %21 : vector<8x8xf32>
    %23 = math.exp2 %22 : vector<8x8xf32>
    %cst_8 = arith.constant dense<0.000000e+00> : vector<8x17xf32>
    %24 = tpu.matmul %23, %14, %cst_8 {dimension_numbers = #tpu.dot_dimension_numbers<[1], [0], [0], [1], [0, 0, 1, 1], [], []>} : vector<8x8xf32>, vector<8x17xf32>, vector<8x17xf32> -> vector<8x17xf32>
    %25 = vector.broadcast %20 : vector<8x1xf32> to vector<8x17xf32>
    %26 = arith.mulf %25, %8 : vector<8x17xf32>
    %27 = arith.addf %26, %24 : vector<8x17xf32>
    %c1_i32 = arith.constant 1 : i32
    %28 = vector.extract_strided_slice %27 {offsets = [0, 16], sizes = [8, 1], strides = [1, 1]} : vector<8x17xf32> to vector<8x1xf32>
    %29 = tpu.reciprocal %28 {approx = true} : vector<8x1xf32> -> vector<8x1xf32>
    %30 = vector.extract_strided_slice %27 {offsets = [0, 0], sizes = [8, 16], strides = [1, 1]} : vector<8x17xf32> to vector<8x16xf32>
    %31 = vector.broadcast %29 : vector<8x1xf32> to vector<8x16xf32>
    %32 = arith.mulf %30, %31 : vector<8x16xf32>
    %c0_9 = arith.constant 0 : index
    %c0_10 = arith.constant 0 : index
    %c0_11 = arith.constant 0 : index
    %33 = vector.load %arg5[%c0_9, %c0_10, %c0_11] : memref<1x8x16xf32, #tpu.memory_space<vmem>>, vector<1x8x16xf32>
    %34 = vector.shape_cast %33 : vector<1x8x16xf32> to vector<8x16xf32>
    %35 = vector.shape_cast %32 : vector<8x16xf32> to vector<1x8x16xf32>
    tpu.vector_store %arg5[%c0_9, %c0_10, %c0_11], %35 {strides = array<i32>} : memref<1x8x16xf32, #tpu.memory_space<vmem>>, vector<1x8x16xf32>,
    return
  }
  func.func @transform_0(%arg0: i32, %arg1: i32) -> (i32, i32, i32) {
    %c0_i32 = arith.constant 0 : i32
    %c0_i32_0 = arith.constant 0 : i32
    %c0_i32_1 = arith.constant 0 : i32
    return %arg0, %c0_i32, %c0_i32_0 : i32, i32, i32
  }
  func.func @transform_1(%arg0: i32, %arg1: i32) -> (i32, i32) {
    %c0_i32 = arith.constant 0 : i32
    %c0_i32_0 = arith.constant 0 : i32
    %c0_i32_1 = arith.constant 0 : i32
    return %c0_i32, %c0_i32_0 : i32, i32
  }
  func.func @transform_2(%arg0: i32, %arg1: i32) -> (i32, i32) {
    %c0_i32 = arith.constant 0 : i32
    %c0_i32_0 = arith.constant 0 : i32
    %c0_i32_1 = arith.constant 0 : i32
    return %c0_i32, %c0_i32_0 : i32, i32
  }
  func.func @transform_3(%arg0: i32, %arg1: i32) -> (i32, i32, i32) {
    %c0_i32 = arith.constant 0 : i32
    %c0_i32_0 = arith.constant 0 : i32
    return %arg0, %arg1, %c0_i32 : i32, i32, i32
  }
}

</mosaic_0001>

<bundles_post_ra>
// kernel: tpu_custom_call.1
= control target key start
LH: loop header
LB: loop body
LE: loop exit
PB: predicated region body
PF: predicated region fallthrough
CT: control target
= control target key end

     0   :  { %8 = vsyncpa [#allocation6], 0  ;;  %s1147_s0 = inlined_call_operand.hbm [shape: f32[2,8,32], index: 0, kind: input, shape index: {}]   ;;  %s1148_s1 = inlined_call_operand.hbm [shape: f32[32,49], index: 1, kind: input, shape index: {}]   ;;  %s1149_s2 = inlined_call_operand.vmem [shape: f32[1,49], index: 2, kind: input, shape index: {}]   ;;  %s1150_s3 = inlined_call_operand.hbm [shape: f32[2,8,16], index: 3, kind: output, shape index: {}]  }
   0x1   :  { %10 = vsyncpa [#allocation6 + $0x1], 0 }
   0x2   :  { %11 = vsyncpa [#allocation9], 0 }
   0x3   :  { %12 = vsyncpa [#allocation7], 0 }
   0x4   :  { %14 = vsyncpa [#allocation7 + $0x1], 0  ;;  %s918_s12 = smov 0   ;;  %s920_s13 = smov 0  }
   0x5   :  { %s922_s14 = smov 0   ;;  %s924_s15 = smov 0  }
   0x6   :  { %s926_s16 = smov 0   ;;  %s928_s17 = smov 0  }
   0x7 LB: > { %s596_s18 = sadd.s32 4294967295, %s885_s17   ;;  %s597_s19 = sadd.s32 4294967294, %s885_s17   ;;  %s885_s17 = sphi %s928_s17, %s20_s17   ;;  %s881_s16 = sphi %s926_s16, %s1174_s16   ;;  %s877_s15 = sphi %s924_s15, %s1173_s15   ;;  %s873_s14 = sphi %s922_s14, %s1172_s14   ;;  %s869_s13 = sphi %s920_s13, %s1171_s13   ;;  %s865_s12 = sphi %s918_s12, %s1170_s12  }
   0x8   : > { %p52_p0 = scmp.ne.s32.totalorder %s869_s13, %s865_s12  ;;  %p952_p1 = scmp.eq.s32.totalorder %s596_s18, 0 }
   0x9   : > { %p956_p2 = scmp.eq.s32.totalorder %s596_s18, 1  ;;  %p126_p3 = scmp.eq.s32.totalorder %s597_s19, 1 }
   0xa   : > { %s1155_s20 = scalar_select %p952_p1, 1, 0 }
   0xb   : > { %s1156_s21 = scalar_select %p956_p2, 1, 0 }
   0xc   : > { %p962_p4 = por %p952_p1, %p52_p0  ;;  %p598_p5 = scmp.ge.s32.totalorder %s885_s17, 1 }
   0xd   : > { %p967_p6 = por %p126_p3, %p52_p0  ;;  %p133_p7 = scmp.lt.s32.totalorder %s885_s17, 3 }
   0xe   : > { %s1157_s22 = scalar_select %p962_p4, 1, 0 }
   0xf   : > { %s1158_s23 = scalar_select %p967_p6, 1, 0 }
  0x10   : > { %p972_p8 = pnand %p598_p5, %p133_p7  ;;  %s887_s25 = smov [#allocation8]  }
  0x11   : > { %s145_s26 = sshll.u32 %s887_s25, 4  ;;  %s32_s28 = sadd.s32 1, %s881_s16  ;;  %s146_s26 = int_to_ptr.vmem [resolvable:$true] %s145_s26 }
  0x12   : > { %s1159_s24 = scalar_select %p972_p8, 1, 0 }
  0x13   : > { %p660_p9 = pneg %p972_p8  ;;  %s741_s4 = scalar_lea.hbm %s1148_s1, 512 }
  0x14   : > { %p742_p12 = scmp.ne.s32.totalorder %s1148_s1, %s741_s4  ;;  %p748_p5 = scmp.lt.u32.totalorder %s741_s4, %s1148_s1 }
  0x15   : > { %p981_p11 = pnand %p660_p9, %p952_p1 }
  0x17   : > { %p743_p13 = pneg %p981_p11 }
  0x19   : > { %p744_p0 = pnand %p743_p13, %p742_p12 }
  0x1b   : > { %p745_p3 = pneg %p744_p0 }
  0x1d   : > { %p750_p7 = pnand %p748_p5, %p745_p3 }
  0x1f   : > { %753 = shalt.err (!%p750_p7)
}
  0x20   : > { %s754_s9 = scalar_lea.vmem %s146_s26, 512  ;;  %p762_p1 = scmp.lt.s32.totalorder %s146_s26, %s146_s26 }
  0x21   : > { %p755_p9 = scmp.ne.s32.totalorder %s146_s26, %s754_s9  ;;  %p763_p4 = scmp.lt.s32.totalorder %s754_s9, %s754_s9 }
  0x23   : > { %p757_p10 = pnand %p755_p9, %p743_p13  ;;  %p764_p8 = por %p763_p4, %p762_p1 }
  0x25   : > { %p758_p6 = pneg %p757_p10 }
  0x27   : > { %p765_p2 = pnand %p764_p8, %p758_p6 }
  0x29   : > { %768 = shalt.err (!%p765_p2)
}
  0x2a   : > { %s888_s10 = smov 128   ;;  %s889_s11 = smov 8  }
  0x2b   : > { %663 = dma.hbm_to_vmem [thread:$0]  (!%p981_p11), %s1148_s1, 512, %s146_s26, [#allocation9], %s888_s10, %s888_s10, %s889_s11  }
  0x2c   : > { %p34_p1 = scmp.ge.s32.totalorder %s32_s28, 2  ;;  %s39_s25 = sadd.s32 1, %s873_s14 }
  0x2d   : > { %p46_p2 = scmp.ne.s32.totalorder %s873_s14, %s869_s13  ;;  %p47_p4 = scmp.eq.s32.totalorder %s885_s17, 0 }
  0x2e   : > { %s1176_s28 = smov (%p34_p1, %s32_s28), 0  ;;  %p1162_p8 = scmp.ne.s32.totalorder %s1156_s21, 0 }
  0x2f   : > { %p1008_p6 = por %p47_p4, %p46_p2  ;;  %s36_s27 = ssub.s32 %s881_s16, %s1176_s28 }
  0x30   : > { %p1014_p10 = por %p1162_p8, %p46_p2  ;;  %p673_p12 = scmp.lt.s32.totalorder %s885_s17, 2 }
  0x31   : > { %p37_p11 = scmp.eq.s32.totalorder %s36_s27, 0  ;;  %s162_s26 = sand.u32 1, %s873_s14  }
  0x32   : > { %s601_s4 = sshll.u32 %s162_s26, 3  ;;  %s602_s6 = sshll.u32 %s881_s16, 7 }
  0x33   : > { %s1023_s5 = scalar_select %p37_p11, %s873_s14, %s39_s25  }
  0x34   : > { %s1029_s9 = scalar_lea.hbm %s1147_s0, %s602_s6  ;;  %s166_s21 = scalar_lea.vmem [#allocation5], %s601_s4 }
  0x35   : > { %s173_s10 = sshll.u32 %s166_s21, 4  ;;  %p1035_p13 = pnand %p673_p12, %p1008_p6  ;;  %s1031_s10 = int_to_ptr.vmem [resolvable:$true] %s173_s10 }
  0x36   : > { %s163_s18 = scalar_lea.sflag [#allocation6], %s162_s26  ;;  %s769_s19 = scalar_lea.hbm %s1029_s9, 128 }
  0x37   : > { %p770_p0 = scmp.ne.s32.totalorder %s1029_s9, %s769_s19  ;;  %p771_p3 = pneg %p1035_p13 }
  0x38   : > { %s774_s4 = scalar_lea.hbm %s1147_s0, 256  ;;  %p775_p9 = scmp.lt.u32.totalorder %s1029_s9, %s1147_s0 }
  0x39   : > { %p772_p5 = pnand %p771_p3, %p770_p0  ;;  %p776_p1 = scmp.lt.u32.totalorder %s774_s4, %s769_s19 }
  0x3a   : > { %p778_p4 = scmp.lt.u32.totalorder %s769_s19, %s1029_s9 }
  0x3b   : > { %p773_p7 = pneg %p772_p5  ;;  %p777_p2 = por %p776_p1, %p775_p9 }
  0x3d   : > { %p779_p6 = por %p778_p4, %p777_p2 }
  0x3f   : > { %p780_p8 = pnand %p779_p6, %p773_p7 }
  0x41   : > { %783 = shalt.err (!%p780_p8)
}
  0x42   : > { %s784_s26 = scalar_lea.vmem %s1031_s10, 128  ;;  %s890_s7 = smov [#allocation5]  }
  0x43   : > { %p785_p12 = scmp.ne.s32.totalorder %s1031_s10, %s784_s26  ;;  %s789_s8 = sshll.u32 %s890_s7, 4  ;;  %s790_s8 = int_to_ptr.vmem [resolvable:$false] %s789_s8 }
  0x44   : > { %s791_s21 = scalar_lea.vmem %s790_s8, 256  ;;  %p792_p5 = scmp.lt.s32.totalorder %s1031_s10, %s790_s8 }
  0x45   : > { %p787_p11 = pnand %p785_p12, %p771_p3  ;;  %p793_p9 = scmp.lt.s32.totalorder %s791_s21, %s784_s26 }
  0x47   : > { %p788_p0 = pneg %p787_p11  ;;  %p794_p1 = por %p793_p9, %p792_p5 }
  0x49   : > { %p795_p2 = pnand %p794_p1, %p788_p0 }
  0x4b   : > { %798 = shalt.err (!%p795_p2)
}
  0x4c   : > { %667 = dma.hbm_to_vmem [thread:$0]  (!%p1035_p13), %s1029_s9, 128, %s1031_s10, %s163_s18  }
  0x4d   : > { %p1165_p7 = scmp.ne.s32.totalorder %s1159_s24, 0 }
  0x4e   : > { %s1067_s19 = sand.u32 (!%p1165_p7), 1, %s869_s13   ;;  %p1166_p3 = scmp.ne.s32.totalorder (!%p1165_p7), %s1157_s22, 0 }
  0x4f   : > { %182 = sbr.rel (%p1165_p7) target bundleno = 1179 (0x49b), region = 32  ;;  %s604_s25 = sshll.u32 (!%p1165_p7), %s1067_s19, 3 }
  0x50   : > { %s185_s27 = scalar_lea.sflag (!%p1165_p7), [#allocation6], %s1067_s19  ;;  %s188_s4 = scalar_lea.vmem (!%p1165_p7), [#allocation5], %s604_s25 }
  0x56   : > { %852 = dma.done.wait (%p1166_p3), %s185_s27, 128  }
  0x57   : > { %854 = vsyncadd (%p1166_p3), %s185_s27, 4294967168  ;;  %p1167_p13 = scmp.ne.s32.totalorder %s1155_s20, 0 }
  0x59   : > { %856 = dma.done.wait (%p1167_p13), [#allocation9], 512  }
  0x5a   : > { %858 = vsyncadd (%p1167_p13), [#allocation9], 4294966784  ;;  %v891_v0 = vmov 0.0|0.0   ;;  %vm892_vm0 = vmmov 0   ;;  %v893_v1 = vmov 0.0   ;;  %v220_v2 = vld [vmem:[#allocation8] sm:$0xff] }
  0x5b   : > { %646 = vmatprep.subr.bf16.mxu0 %v891_v0  ;;  %633 = vmatprep.mubr.msk.f32.mxu0 %vm892_vm0, %v893_v1  ;;  %v221_v3 = vld [vmem:[#allocation8 + $0x8] sm:$0xff]  ;;  %v222_v4 = vld [vmem:[#allocation8 + $0x10] sm:$0xff]  ;;  %v223_v6 = vld [vmem:[#allocation8 + $0x18] sm:$0xff]  ;;  %vm231_vm1 = vcmask 261120   ;;  %vm305_vm2 = vcmask 130048   ;;  %s894_s24 = smov 96  }
  0x5c   : > { %636 = vmatprep.subr.mxu1 %v893_v1  ;;  %638 = vmatprep.mubr.msk.f32.mxu1 %vm892_vm0, %v893_v1  ;;  %v647_v5 = vpack.c.bf16 %v221_v3, %v220_v2  ;;  %v650_v7 = vpack.c.bf16 %v223_v6, %v222_v4  ;;  %v219_v8 = vld [vmem:[%s188_s4] sm:$0xff]  ;;  %s895_s9 = smov 112   ;;  %vm315_vm3 = vcmask 138240   ;;  %vm399_vm4 = vcmask 64512   ;;  %s613_s10 = sshll.u32 %s877_s15, 7 }
  0x5d   : > { %v607_v9 = vld [vmem:[%s1149_s2] ss:$0 sm:$0xff]  ;;  %v896_v24 = vmov 16   ;;  %s214_s11 = scalar_lea.vmem [#allocation10], %s604_s25  ;;  %s1097_s26 = scalar_lea.hbm %s1150_s3, %s613_s10 }
  0x5e   : > { %648 = vmatpush3.bf16.msra.mxu0 %v647_v5  ;;  %733 = vset.pattern.permute.xlu1 %v896_v24  ;;  %s505_s18 = sshll.u32 %s214_s11, 4  ;;  %s491_s7 = scalar_lea.sflag [#allocation7], %s1067_s19  ;;  %s1099_s18 = int_to_ptr.vmem [resolvable:$true] %s505_s18 }
  0x5f   : > { %649 = vmatprep.subr.bf16.mxu0 %v891_v0  ;;  %734 = vset.pattern.permute.xlu0 %v896_v24  ;;  %s799_s8 = scalar_lea.vmem %s1099_s18, 128  ;;  %s897_s15 = smov [#allocation10]  }
  0x60   : > { %p800_p4 = scmp.ne.s32.totalorder %s1099_s18, %s799_s8  ;;  %s803_s21 = sshll.u32 %s897_s15, 4  ;;  %s804_s21 = int_to_ptr.vmem [resolvable:$false] %s803_s21 }
  0x61   : > { %s805_s25 = scalar_lea.vmem %s804_s21, 256  ;;  %p806_p12 = scmp.lt.s32.totalorder %s1099_s18, %s804_s21 }
  0x62   : > { %651 = vmatpush3.bf16.msra.mxu0 %v650_v7  ;;  %p801_p6 = pnand %p800_p4, %p1014_p10  ;;  %p807_p11 = scmp.lt.s32.totalorder %s805_s25, %s799_s8 }
  0x64   : > { %p802_p8 = pneg %p801_p6  ;;  %p808_p0 = por %p807_p11, %p806_p12 }
  0x65   : > { %634 = vmatmul.mubr.msk.f32.vlgmr.msra.gmra.mrb[0].mxu0 %vm231_vm1, %v219_v8 }
  0x66   : > { %p809_p5 = pnand %p808_p0, %p802_p8 }
 0x138   : > { %v301_v10 = vpop.f32.mrb[0].mxu0 }
 0x139   : > { %v302_v11 = vadd.f32 %v607_v9, %v301_v10  ;;  %v635_v12 = vpop.f32.mrb[1].mxu0 }
 0x13b   : > { %306 = vst.msk [vmem:[#allocation2] sm:$0xff] %vm305_vm2, %v302_v11  ;;  %312 = vrot.lane.b32.xlu1 %v302_v11, %s894_s24  ;;  %308 = vrot.lane.b32.xlu0 %v302_v11, %s895_s9 }
 0x142   : > { %v319_v16 = vld [vmem:[#allocation2] sm:$0xff] }
 0x1ad   : > { %v313_v13 = vpop.permute.xlu1 %312  ;;  %v309_v14 = vpop.permute.xlu0 %308 }
 0x1ae   : > { %316 = vst.msk [vmem:[#allocation4] sm:$0xff] %vm315_vm3, %v313_v13 }
 0x1af   : > { %311 = vst.msk [vmem:[#allocation3] sm:$0xff] %vm305_vm2, %v309_v14 }
 0x1b5   : > { %v321_v17 = vld [vmem:[#allocation4] sm:$0xff] }
 0x1b6   : > { %v320_v15 = vld [vmem:[#allocation3] sm:$0xff] }
 0x1b7   : > { %637 = vmatpush3.xpose.msk.msra.mxu1 %vm305_vm2, %v320_v15 }
 0x1b8   : > { %641 = vmatprep.subr.mxu1 %v893_v1 }
 0x1ba   : > { %639 = vmatmul.mubr.msk.f32.vlgmr.msra.gmra.mrb[0].mxu1 %vm305_vm2, %v319_v16 }
 0x1bb   : > { %642 = vmatpush3.msra.mxu1 %v321_v17  ;;  %643 = vmatprep.mubr.msk.f32.mxu1 %vm892_vm0, %v893_v1 }
 0x28d   : > { %v395_v18 = vpop.f32.mrb[0].mxu1 }
 0x28e   : > { %v640_v19 = vpop.f32.mrb[1].mxu1  ;;  %v400_v20 = vsel %vm399_vm4, %v395_v18, -inf }
 0x28f   : > { %401 = vmax.xlane.f32.xlu0 %v400_v20 }
 0x31c   : > { %v402_v21 = vpop.xlane.xlu0 %401 }
 0x31d   : > { %v405_v22 = vsub.f32 %v395_v18, %v402_v21  ;;  %v403_v25 = vsub.f32 -inf, %v402_v21 }
 0x31f   : > { %735 = vpow2.f32 %v405_v22 }
 0x320   : > { %737 = vpow2.f32 %v403_v25 }
 0x329   : > { %v736_v23 = vpop.eup %735 }
 0x32a   : > { %644 = vmatmul.mubr.msk.f32.vlgmr.msra.gmra.mrb[2].mxu1 %vm399_vm4, %v736_v23  ;;  %v738_v26 = vpop.eup %737 }
 0x32b   : > { %v480_v27 = vmul.f32 0.0, %v738_v26 }
 0x3fd   : > { %v476_v28 = vpop.f32.mrb[2].mxu1 }
 0x3fe   : > { %v481_v29 = vadd.f32 %v480_v27, %v476_v28  ;;  %v645_v30 = vpop.f32.mrb[3].mxu1 }
 0x400   : > { %739 = vrcp.f32 %v481_v29 }
 0x40a   : > { %v740_v31 = vpop.eup %739 }
 0x40b   : > { %485 = vperm.xlu1 %733, %v740_v31  }
 0x48a   : > { %v486_v32 = vpop.permute.xlu1 %485 }
 0x48b   : > { %v488_v33 = vmul.f32 %v486_v32, %v481_v29 }
 0x48d   : > { %489 = vst.msk [vmem:[%s214_s11] sm:$0xff] %vm305_vm2, %v488_v33 }
 0x48e   : > { %812 = shalt.err (!%p809_p5)
}
 0x48f   : > { %s813_s19 = scalar_lea.hbm %s1097_s26, 128  ;;  %s817_s20 = scalar_lea.hbm %s1150_s3, 256 }
 0x490   : > { %p814_p9 = scmp.ne.s32.totalorder %s1097_s26, %s813_s19  ;;  %p818_p7 = scmp.lt.u32.totalorder %s1097_s26, %s1150_s3 }
 0x491   : > { %p819_p3 = scmp.lt.u32.totalorder %s817_s20, %s813_s19  ;;  %p821_p4 = scmp.lt.u32.totalorder %s813_s19, %s1097_s26 }
 0x492   : > { %p815_p1 = pnand %p814_p9, %p1014_p10 }
 0x493   : > { %p820_p13 = por %p819_p3, %p818_p7 }
 0x494   : > { %p816_p2 = pneg %p815_p1 }
 0x495   : > { %p822_p6 = por %p821_p4, %p820_p13 }
 0x497   : > { %p823_p8 = pnand %p822_p6, %p816_p2 }
 0x499   : > { %826 = shalt.err (!%p823_p8)
}
 0x49a   : > { %658 = dma.vmem_to_hbm [thread:$0]  (%p1014_p10), %s1099_s18, 128, %s1097_s26, %s491_s7  }
 0x49b PF: > { %s517_s9 = sand.u32 1, %s865_s12   ;;  %p1168_p12 = scmp.ne.s32.totalorder %s1158_s23, 0 }
 0x49c   : > { %p1169_p11 = scmp.ge.s32.totalorder %s885_s17, 2  ;;  %s518_s10 = scalar_lea.sflag [#allocation7], %s517_s9 }
 0x49e   : > { %p669_p0 = pnand %p1169_p11, %p1168_p12 }
 0x4a0   : > { %860 = dma.done.wait (!%p669_p0), %s518_s10, 128  }
 0x4a1   : > { %862 = vsyncadd (!%p669_p0), %s518_s10, 4294967168  ;;  %s20_s17 = sadd.s32 1, %s885_s17   ;;  %s1170_s12 = smov %s869_s13 }
 0x4a2   : > { %p17_p5 = scmp.ge.s32.totalorder %s20_s17, 4   ;;  %s1171_s13 = smov %s873_s14 }
 0x4a3   : > { %s1172_s14 = smov %s1023_s5  ;;  %s1173_s15 = smov %s881_s16 }
 0x4a4   : > { %s1174_s16 = smov %s1176_s28  ;;  %19 = sbr.rel (!%p17_p5) target bundleno = 7 (0x7), region = 86 }
 0x4ab   :  { %523 = vsyncpa [#allocation6], 1 }
 0x4ac   :  { %525 = vsyncpa [#allocation6 + $0x1], 1 }
 0x4ad   :  { %526 = vsyncpa [#allocation9], 1 }
 0x4ae   :  { %527 = vsyncpa [#allocation7], 1 }
 0x4af   :  { %529 = vsyncpa [#allocation7 + $0x1], 1 }

</bundles_post_ra>
